<compile_context>
chip_gen: v6e
topology: v6e:2x2x1
jax: 0.10.0
libtpu: 0.0.40
codegen_flags: <defaults>
</compile_context>

<pallas_src>
import functools

import jax
import jax.numpy as jnp
from jax.experimental import pallas as pl
from jax.experimental.pallas import tpu as pltpu


def _reshape_irreps_kernel(x_ref, o_ref, *, muls, dims):
    """x_ref: (tb, F) block; o_ref: (tb, mul*D) flat block.

    For irrep i with (mul, d) and offsets (ix_i in input, off_i in output):
        out_flat[b, m*D + off_i + k] = x[b, ix_i + m*d + k]
    which is exactly the slice/reshape/concat of the PyTorch forward, written
    as static contiguous lane-range copies (no reshape, no masked-lane math).
    """
    D = sum(dims)
    ix = 0
    off = 0
    for mul, d in zip(muls, dims):
        # TODO(synk): for very large mul (e.g. 128+) a strided DMA or fusing this
        # permutation into the consumer kernel would avoid the long static unroll.
        for m in range(mul):
            o_ref[:, m * D + off : m * D + off + d] = x_ref[:, ix + m * d : ix + m * d + d]
        ix += mul * d
        off += d


def reshape_irreps_pallas(x, muls, dims, *, batch_tile=None,
                          vmem_budget_bytes=12 * 1024 * 1024):
    """JAX/Pallas equivalent of reshape_irreps.forward (cueq_config=None).

    x: (batch, sum(mul_i * d_i)) -> (batch, mul, sum(d_i))
    """
    muls = tuple(int(m) for m in muls)
    dims = tuple(int(d) for d in dims)
    assert len(set(muls)) == 1, "concat along last dim requires equal multiplicities"
    mul = muls[0]
    D = sum(dims)
    F = sum(m * d for m, d in zip(muls, dims))
    assert F == mul * D

    batch = x.shape[0]
    assert x.shape[1] == F

    itemsize = jnp.dtype(x.dtype).itemsize
    # sublane packing granularity: f32 -> 8, bf16 -> 16, int8 -> 32
    sub = max(8, 32 // itemsize)

    # VMEM per grid step ~ 2 (double buffer) * tb * (F_in + F_out) * itemsize,
    # and F_out == mul*D == F.  Budget kept well under the smallest scoped
    # default (v5e: 16 MiB) so no vmem_limit override is needed on any gen.
    tb_vmem = max(sub, vmem_budget_bytes // (4 * F * itemsize))
    tb = batch_tile if batch_tile is not None else 2048
    tb = min(tb, tb_vmem, batch)
    if tb >= batch:
        tb = batch                      # single block spanning the full batch dim
    else:
        tb = (tb // sub) * sub          # keep (sublane,128) tiling rule happy
        if tb == 0:
            tb = batch

    grid = (pl.cdiv(batch, tb),)        # ragged tail handled by Pallas masking

    kernel = functools.partial(_reshape_irreps_kernel, muls=muls, dims=dims)

    out_flat = pl.pallas_call(
        kernel,
        out_shape=jax.ShapeDtypeStruct((batch, mul * D), x.dtype),
        grid_spec=pltpu.PrefetchScalarGridSpec(
            num_scalar_prefetch=0,
            grid=grid,
            in_specs=[pl.BlockSpec((tb, F), lambda i: (i, 0))],
            out_specs=pl.BlockSpec((tb, mul * D), lambda i: (i, 0)),
        ),
        compiler_params=pltpu.CompilerParams(
            dimension_semantics=("parallel",),
        ),
    )(x)

    # Pure layout plumbing: (batch, mul*D) is row-major identical to (batch, mul, D).
    return out_flat.reshape(batch, mul, D)


def reshape_irreps_ref(x, muls, dims):
    """Pure-JAX reference mirroring the PyTorch forward (cueq_config=None)."""
    batch = x.shape[0]
    ix = 0
    out = []
    for mul, d in zip(muls, dims):
        field = x[:, ix : ix + mul * d]
        ix += mul * d
        out.append(field.reshape(batch, mul, d))
    return jnp.concatenate(out, axis=-1)


if __name__ == "__main__":
    # irreps = "4x0e + 4x1o + 4x2e"  ->  muls = [4, 4, 4], dims = [1, 3, 5]
    muls = [4, 4, 4]
    dims = [1, 3, 5]
    F = sum(m * d for m, d in zip(muls, dims))  # 36
    D = sum(dims)                               # 9

    key = jax.random.PRNGKey(0)

    # Test 1: batch fits in a single tile.
    batch = 16
    x = jax.random.normal(key, (batch, F), dtype=jnp.float32)
    out = jax.block_until_ready(reshape_irreps_pallas(x, muls, dims))
    ref = reshape_irreps_ref(x, muls, dims)
    assert out.shape == ref.shape == (batch, muls[0], D)
    assert out.dtype == ref.dtype
    assert jnp.array_equal(out, ref), "Pallas output mismatch vs reference (test 1)"

    # Test 2: ragged batch with a forced small tile (exercises boundary masking).
    batch2 = 20
    x2 = jax.random.normal(jax.random.PRNGKey(1), (batch2, F), dtype=jnp.float32)
    out2 = jax.block_until_ready(reshape_irreps_pallas(x2, muls, dims, batch_tile=8))
    ref2 = reshape_irreps_ref(x2, muls, dims)
    assert out2.shape == ref2.shape == (batch2, muls[0], D)
    assert jnp.array_equal(out2, ref2), "Pallas output mismatch vs reference (test 2)"

    print("KERNEL_OK")
</pallas_src>

<mosaic_0001>
module attributes {stable_mosaic.version = 11 : i64} {
  func.func @_reshape_irreps_kernel(%arg0: i32, %arg1: memref<16x36xf32, #tpu.memory_space<vmem>>, %arg2: memref<16x36xf32, #tpu.memory_space<vmem>>) attributes {dimension_semantics = [#tpu.dimension_semantics<parallel>], iteration_bounds = array<i64: 1>, scalar_prefetch = 0 : i64, scratch_operands = 0 : i64, tpu.core_type = #tpu.core_type<tc>, window_params = [{transform_indices = @transform_0, window_bounds = array<i64: 16, 36>}, {transform_indices = @transform_1, window_bounds = array<i64: 16, 36>}]} {
    %c0 = arith.constant 0 : index
    %c0_0 = arith.constant 0 : index
    %0 = vector.load %arg1[%c0, %c0_0] : memref<16x36xf32, #tpu.memory_space<vmem>>, vector<16x1xf32>
    %c0_1 = arith.constant 0 : index
    %c0_2 = arith.constant 0 : index
    %1 = vector.load %arg2[%c0_1, %c0_2] : memref<16x36xf32, #tpu.memory_space<vmem>>, vector<16x1xf32>
    tpu.vector_store %arg2[%c0_1, %c0_2], %0 {strides = array<i32>} : memref<16x36xf32, #tpu.memory_space<vmem>>, vector<16x1xf32>,
    %c0_3 = arith.constant 0 : index
    %c1 = arith.constant 1 : index
    %2 = vector.load %arg1[%c0_3, %c1] : memref<16x36xf32, #tpu.memory_space<vmem>>, vector<16x1xf32>
    %c0_4 = arith.constant 0 : index
    %c9 = arith.constant 9 : index
    %3 = vector.load %arg2[%c0_4, %c9] : memref<16x36xf32, #tpu.memory_space<vmem>>, vector<16x1xf32>
    tpu.vector_store %arg2[%c0_4, %c9], %2 {strides = array<i32>} : memref<16x36xf32, #tpu.memory_space<vmem>>, vector<16x1xf32>,
    %c0_5 = arith.constant 0 : index
    %c2 = arith.constant 2 : index
    %4 = vector.load %arg1[%c0_5, %c2] : memref<16x36xf32, #tpu.memory_space<vmem>>, vector<16x1xf32>
    %c0_6 = arith.constant 0 : index
    %c18 = arith.constant 18 : index
    %5 = vector.load %arg2[%c0_6, %c18] : memref<16x36xf32, #tpu.memory_space<vmem>>, vector<16x1xf32>
    tpu.vector_store %arg2[%c0_6, %c18], %4 {strides = array<i32>} : memref<16x36xf32, #tpu.memory_space<vmem>>, vector<16x1xf32>,
    %c0_7 = arith.constant 0 : index
    %c3 = arith.constant 3 : index
    %6 = vector.load %arg1[%c0_7, %c3] : memref<16x36xf32, #tpu.memory_space<vmem>>, vector<16x1xf32>
    %c0_8 = arith.constant 0 : index
    %c27 = arith.constant 27 : index
    %7 = vector.load %arg2[%c0_8, %c27] : memref<16x36xf32, #tpu.memory_space<vmem>>, vector<16x1xf32>
    tpu.vector_store %arg2[%c0_8, %c27], %6 {strides = array<i32>} : memref<16x36xf32, #tpu.memory_space<vmem>>, vector<16x1xf32>,
    %c0_9 = arith.constant 0 : index
    %c4 = arith.constant 4 : index
    %8 = vector.load %arg1[%c0_9, %c4] : memref<16x36xf32, #tpu.memory_space<vmem>>, vector<16x3xf32>
    %c0_10 = arith.constant 0 : index
    %c1_11 = arith.constant 1 : index
    %9 = vector.load %arg2[%c0_10, %c1_11] : memref<16x36xf32, #tpu.memory_space<vmem>>, vector<16x3xf32>
    tpu.vector_store %arg2[%c0_10, %c1_11], %8 {strides = array<i32>} : memref<16x36xf32, #tpu.memory_space<vmem>>, vector<16x3xf32>,
    %c0_12 = arith.constant 0 : index
    %c7 = arith.constant 7 : index
    %10 = vector.load %arg1[%c0_12, %c7] : memref<16x36xf32, #tpu.memory_space<vmem>>, vector<16x3xf32>
    %c0_13 = arith.constant 0 : index
    %c10 = arith.constant 10 : index
    %11 = vector.load %arg2[%c0_13, %c10] : memref<16x36xf32, #tpu.memory_space<vmem>>, vector<16x3xf32>
    tpu.vector_store %arg2[%c0_13, %c10], %10 {strides = array<i32>} : memref<16x36xf32, #tpu.memory_space<vmem>>, vector<16x3xf32>,
    %c0_14 = arith.constant 0 : index
    %c10_15 = arith.constant 10 : index
    %12 = vector.load %arg1[%c0_14, %c10_15] : memref<16x36xf32, #tpu.memory_space<vmem>>, vector<16x3xf32>
    %c0_16 = arith.constant 0 : index
    %c19 = arith.constant 19 : index
    %13 = vector.load %arg2[%c0_16, %c19] : memref<16x36xf32, #tpu.memory_space<vmem>>, vector<16x3xf32>
    tpu.vector_store %arg2[%c0_16, %c19], %12 {strides = array<i32>} : memref<16x36xf32, #tpu.memory_space<vmem>>, vector<16x3xf32>,
    %c0_17 = arith.constant 0 : index
    %c13 = arith.constant 13 : index
    %14 = vector.load %arg1[%c0_17, %c13] : memref<16x36xf32, #tpu.memory_space<vmem>>, vector<16x3xf32>
    %c0_18 = arith.constant 0 : index
    %c28 = arith.constant 28 : index
    %15 = vector.load %arg2[%c0_18, %c28] : memref<16x36xf32, #tpu.memory_space<vmem>>, vector<16x3xf32>
    tpu.vector_store %arg2[%c0_18, %c28], %14 {strides = array<i32>} : memref<16x36xf32, #tpu.memory_space<vmem>>, vector<16x3xf32>,
    %c0_19 = arith.constant 0 : index
    %c16 = arith.constant 16 : index
    %16 = vector.load %arg1[%c0_19, %c16] : memref<16x36xf32, #tpu.memory_space<vmem>>, vector<16x5xf32>
    %c0_20 = arith.constant 0 : index
    %c4_21 = arith.constant 4 : index
    %17 = vector.load %arg2[%c0_20, %c4_21] : memref<16x36xf32, #tpu.memory_space<vmem>>, vector<16x5xf32>
    tpu.vector_store %arg2[%c0_20, %c4_21], %16 {strides = array<i32>} : memref<16x36xf32, #tpu.memory_space<vmem>>, vector<16x5xf32>,
    %c0_22 = arith.constant 0 : index
    %c21 = arith.constant 21 : index
    %18 = vector.load %arg1[%c0_22, %c21] : memref<16x36xf32, #tpu.memory_space<vmem>>, vector<16x5xf32>
    %c0_23 = arith.constant 0 : index
    %c13_24 = arith.constant 13 : index
    %19 = vector.load %arg2[%c0_23, %c13_24] : memref<16x36xf32, #tpu.memory_space<vmem>>, vector<16x5xf32>
    tpu.vector_store %arg2[%c0_23, %c13_24], %18 {strides = array<i32>} : memref<16x36xf32, #tpu.memory_space<vmem>>, vector<16x5xf32>,
    %c0_25 = arith.constant 0 : index
    %c26 = arith.constant 26 : index
    %20 = vector.load %arg1[%c0_25, %c26] : memref<16x36xf32, #tpu.memory_space<vmem>>, vector<16x5xf32>
    %c0_26 = arith.constant 0 : index
    %c22 = arith.constant 22 : index
    %21 = vector.load %arg2[%c0_26, %c22] : memref<16x36xf32, #tpu.memory_space<vmem>>, vector<16x5xf32>
    tpu.vector_store %arg2[%c0_26, %c22], %20 {strides = array<i32>} : memref<16x36xf32, #tpu.memory_space<vmem>>, vector<16x5xf32>,
    %c0_27 = arith.constant 0 : index
    %c31 = arith.constant 31 : index
    %22 = vector.load %arg1[%c0_27, %c31] : memref<16x36xf32, #tpu.memory_space<vmem>>, vector<16x5xf32>
    %c0_28 = arith.constant 0 : index
    %c31_29 = arith.constant 31 : index
    %23 = vector.load %arg2[%c0_28, %c31_29] : memref<16x36xf32, #tpu.memory_space<vmem>>, vector<16x5xf32>
    tpu.vector_store %arg2[%c0_28, %c31_29], %22 {strides = array<i32>} : memref<16x36xf32, #tpu.memory_space<vmem>>, vector<16x5xf32>,
    return
  }
  func.func @transform_0(%arg0: i32) -> (i32, i32) {
    %c0_i32 = arith.constant 0 : i32
    %c0_i32_0 = arith.constant 0 : i32
    return %arg0, %c0_i32 : i32, i32
  }
  func.func @transform_1(%arg0: i32) -> (i32, i32) {
    %c0_i32 = arith.constant 0 : i32
    %c0_i32_0 = arith.constant 0 : i32
    return %arg0, %c0_i32 : i32, i32
  }
}

</mosaic_0001>

<bundles_post_ra>
// kernel: tpu_custom_call.1
= control target key start
LH: loop header
LB: loop body
LE: loop exit
PB: predicated region body
PF: predicated region fallthrough
CT: control target
= control target key end

     0   :  { %6 = vsyncpa [#allocation3], 0  ;;  %s302_s0 = inlined_call_operand.hbm [shape: f32[16,36], index: 0, kind: input, shape index: {}]   ;;  %s303_s1 = inlined_call_operand.hbm [shape: f32[16,36], index: 1, kind: output, shape index: {}]  }
   0x1   :  { %7 = vsyncpa [#allocation4], 0  ;;  %s237_s6 = smov [#allocation2]  }
   0x2   :  { %s13_s7 = sshll.u32 %s237_s6, 4  ;;  %s14_s7 = int_to_ptr.vmem [resolvable:$true] %s13_s7 }
   0x3   :  { %s201_s8 = scalar_lea.vmem %s14_s7, 256  ;;  %p206_p1 = scmp.lt.s32.totalorder %s14_s7, %s14_s7 }
   0x4   :  { %p202_p0 = scmp.ne.s32.totalorder %s14_s7, %s201_s8  ;;  %p207_p2 = scmp.lt.s32.totalorder %s201_s8, %s201_s8 }
   0x6   :  { %p208_p3 = por %p207_p2, %p206_p1 }
   0x8   :  { %p209_p4 = pnand %p208_p3, %p202_p0 }
   0xa   :  { %212 = shalt.err (!%p209_p4)
}
   0xb   :  { %s238_s9 = smov 128   ;;  %s239_s10 = smov 8  }
   0xc   :  { %19 = dma.hbm_to_vmem [thread:$0]  %s302_s0, 256, %s14_s7, [#allocation3], %s238_s9, %s238_s9, %s239_s10  }
   0xd   :  { %233 = dma.done.wait [#allocation3], 256  }
   0xe   :  { %234 = vsyncadd [#allocation3], 4294967040  ;;  %vm25_vm0 = vcmask 7168   ;;  %v266_v0 = vld [vmem:[#allocation2] sm:$0xff]  ;;  %v268_v1 = vld [vmem:[#allocation2 + $0x8] sm:$0xff]  ;;  %s240_s13 = smov 16  }
   0xf   :  { %45 = vrot.lane.b32.xlu1 %v266_v0, %s240_s13  ;;  %32 = vrot.lane.b32.xlu0 %v266_v0, %s239_s10  ;;  %26 = vst.msk [vmem:[#allocation5] sm:$0xff] %vm25_vm0, %v266_v0  ;;  %27 = vst.msk [vmem:[#allocation5 + $0x8] sm:$0xff] %vm25_vm0, %v268_v1  ;;  %s241_s0 = smov 24   ;;  %s242_s14 = smov 125   ;;  %vm38_vm1 = vcmask 80968   ;;  %vm51_vm2 = vcmask 154768  }
  0x10   :  { %s243_s15 = smov 3   ;;  %s244_s16 = smov 9   ;;  %vm64_vm3 = vcmask 228568   ;;  %vm77_vm4 = vcmask 31752   ;;  %vm90_vm5 = vcmask 105552   ;;  %vm103_vm6 = vcmask 179352  }
  0x11   :  { %s245_s17 = smov 15   ;;  %s246_s18 = smov 116   ;;  %vm116_vm7 = vcmask 253152   ;;  %vm129_vm8 = vcmask 72736   ;;  %vm142_vm9 = vcmask 146536   ;;  %vm155_vm10 = vcmask 220336  }
  0x12   :  { %s247_s19 = smov 120   ;;  %s248_s20 = smov 124   ;;  %vm160_vm11 = vcmask 294136  }
  0x13   :  { %47 = vrot.lane.b32.xlu1 %v268_v1, %s240_s13  ;;  %34 = vrot.lane.b32.xlu0 %v268_v1, %s239_s10  ;;  %s249_s21 = smov [#allocation5]  }
  0x14   :  { %s168_s22 = sshll.u32 %s249_s21, 4  ;;  %s169_s22 = int_to_ptr.vmem [resolvable:$true] %s168_s22 }
  0x15   :  { %s213_s23 = scalar_lea.vmem %s169_s22, 256  ;;  %p218_p6 = scmp.lt.s32.totalorder %s169_s22, %s169_s22 }
  0x16   :  { %p214_p5 = scmp.ne.s32.totalorder %s169_s22, %s213_s23  ;;  %p219_p7 = scmp.lt.s32.totalorder %s213_s23, %s213_s23 }
  0x17   :  { %60 = vrot.lane.b32.xlu1 %v268_v1, %s241_s0  ;;  %58 = vrot.lane.b32.xlu0 %v266_v0, %s241_s0 }
  0x18   :  { %p220_p8 = por %p219_p7, %p218_p6 }
  0x1a   :  { %p221_p9 = pnand %p220_p8, %p214_p5 }
  0x1b   :  { %73 = vrot.lane.b32.xlu1 %v268_v1, %s242_s14  ;;  %71 = vrot.lane.b32.xlu0 %v266_v0, %s242_s14 }
  0x1f   :  { %86 = vrot.lane.b32.xlu1 %v268_v1, %s243_s15  ;;  %84 = vrot.lane.b32.xlu0 %v266_v0, %s243_s15 }
  0x23   :  { %99 = vrot.lane.b32.xlu1 %v268_v1, %s244_s16  ;;  %97 = vrot.lane.b32.xlu0 %v266_v0, %s244_s16 }
  0x27   :  { %112 = vrot.lane.b32.xlu1 %v268_v1, %s245_s17  ;;  %110 = vrot.lane.b32.xlu0 %v266_v0, %s245_s17 }
  0x2b   :  { %125 = vrot.lane.b32.xlu1 %v268_v1, %s246_s18  ;;  %123 = vrot.lane.b32.xlu0 %v266_v0, %s246_s18 }
  0x2f   :  { %138 = vrot.lane.b32.xlu1 %v268_v1, %s247_s19  ;;  %136 = vrot.lane.b32.xlu0 %v266_v0, %s247_s19 }
  0x33   :  { %151 = vrot.lane.b32.xlu1 %v268_v1, %s248_s20  ;;  %149 = vrot.lane.b32.xlu0 %v266_v0, %s248_s20 }
  0x81   :  { %v46_v2 = vpop.permute.xlu1 %45  ;;  %v33_v3 = vpop.permute.xlu0 %32 }
  0x82   :  { %39 = vst.msk [vmem:[#allocation5] sm:$0xff] %vm38_vm1, %v33_v3 }
  0x83   :  { %52 = vst.msk [vmem:[#allocation5] sm:$0xff] %vm51_vm2, %v46_v2 }
  0x85   :  { %v48_v4 = vpop.permute.xlu1 %47  ;;  %v35_v5 = vpop.permute.xlu0 %34 }
  0x86   :  { %40 = vst.msk [vmem:[#allocation5 + $0x8] sm:$0xff] %vm38_vm1, %v35_v5 }
  0x87   :  { %53 = vst.msk [vmem:[#allocation5 + $0x8] sm:$0xff] %vm51_vm2, %v48_v4 }
  0x89   :  { %v61_v6 = vpop.permute.xlu1 %60  ;;  %v59_v7 = vpop.permute.xlu0 %58 }
  0x8a   :  { %66 = vst.msk [vmem:[#allocation5 + $0x8] sm:$0xff] %vm64_vm3, %v61_v6  ;;  %65 = vst.msk [vmem:[#allocation5] sm:$0xff] %vm64_vm3, %v59_v7 }
  0x8d   :  { %v74_v8 = vpop.permute.xlu1 %73  ;;  %v72_v9 = vpop.permute.xlu0 %71 }
  0x8e   :  { %79 = vst.msk [vmem:[#allocation5 + $0x8] sm:$0xff] %vm77_vm4, %v74_v8  ;;  %78 = vst.msk [vmem:[#allocation5] sm:$0xff] %vm77_vm4, %v72_v9 }
  0x91   :  { %v87_v10 = vpop.permute.xlu1 %86  ;;  %v85_v11 = vpop.permute.xlu0 %84 }
  0x92   :  { %92 = vst.msk [vmem:[#allocation5 + $0x8] sm:$0xff] %vm90_vm5, %v87_v10  ;;  %91 = vst.msk [vmem:[#allocation5] sm:$0xff] %vm90_vm5, %v85_v11 }
  0x95   :  { %v100_v12 = vpop.permute.xlu1 %99  ;;  %v98_v13 = vpop.permute.xlu0 %97 }
  0x96   :  { %105 = vst.msk [vmem:[#allocation5 + $0x8] sm:$0xff] %vm103_vm6, %v100_v12  ;;  %104 = vst.msk [vmem:[#allocation5] sm:$0xff] %vm103_vm6, %v98_v13 }
  0x99   :  { %v113_v14 = vpop.permute.xlu1 %112  ;;  %v111_v15 = vpop.permute.xlu0 %110 }
  0x9a   :  { %118 = vst.msk [vmem:[#allocation5 + $0x8] sm:$0xff] %vm116_vm7, %v113_v14  ;;  %117 = vst.msk [vmem:[#allocation5] sm:$0xff] %vm116_vm7, %v111_v15 }
  0x9d   :  { %v126_v16 = vpop.permute.xlu1 %125  ;;  %v124_v17 = vpop.permute.xlu0 %123 }
  0x9e   :  { %131 = vst.msk [vmem:[#allocation5 + $0x8] sm:$0xff] %vm129_vm8, %v126_v16  ;;  %130 = vst.msk [vmem:[#allocation5] sm:$0xff] %vm129_vm8, %v124_v17 }
  0xa1   :  { %v139_v18 = vpop.permute.xlu1 %138  ;;  %v137_v19 = vpop.permute.xlu0 %136 }
  0xa2   :  { %144 = vst.msk [vmem:[#allocation5 + $0x8] sm:$0xff] %vm142_vm9, %v139_v18  ;;  %143 = vst.msk [vmem:[#allocation5] sm:$0xff] %vm142_vm9, %v137_v19 }
  0xa5   :  { %v152_v20 = vpop.permute.xlu1 %151  ;;  %v150_v21 = vpop.permute.xlu0 %149 }
  0xa6   :  { %157 = vst.msk [vmem:[#allocation5 + $0x8] sm:$0xff] %vm155_vm10, %v152_v20  ;;  %156 = vst.msk [vmem:[#allocation5] sm:$0xff] %vm155_vm10, %v150_v21 }
  0xa7   :  { %161 = vst.msk [vmem:[#allocation5] sm:$0xff] %vm160_vm11, %v266_v0  ;;  %162 = vst.msk [vmem:[#allocation5 + $0x8] sm:$0xff] %vm160_vm11, %v268_v1 }
  0xa8   :  { %224 = shalt.err (!%p221_p9)
}
  0xa9   :  { %174 = dma.vmem_to_hbm [thread:$0]  %s169_s22, 256, %s303_s1, [#allocation4], %s238_s9, %s238_s9, %s239_s10  }
  0xaa   :  { %235 = dma.done.wait [#allocation4], 256  }
  0xab   :  { %236 = vsyncadd [#allocation4], 4294967040 }
  0xac   :  { %178 = vsyncpa [#allocation3], 1 }
  0xad   :  { %179 = vsyncpa [#allocation4], 1 }

</bundles_post_ra>
